<compile_context>
chip_gen: v7x
topology: tpu7x:2x2x1
jax: 0.10.0
libtpu: 0.0.40
codegen_flags: <defaults>
</compile_context>

<pallas_src>
import functools

import jax
import jax.numpy as jnp
from jax.experimental import pallas as pl
from jax.experimental.pallas import tpu as pltpu


def _round_up(a, b):
    return ((a + b - 1) // b) * b


def _largest_divisor_leq(n, cap):
    cap = max(1, min(n, cap))
    for d in range(cap, 0, -1):
        if n % d == 0:
            return d
    return 1


def se_kernel(x_ref, w1t_ref, b1_ref, a_ref, w2t_ref, b2_ref, o_ref,
              *, excite_in_act_dtype):
    # x_ref block: (NB, C, HW) -- spatial axis on lanes
    xb = x_ref[...]
    hw = xb.shape[-1]

    # --- squeeze: global average pool over the spatial (lane) axis -----------
    # f32 accumulation regardless of activation dtype.  (VPU/XLU lane-reduce;
    # ~4-5x under the per-block DMA time, so it never co-limits -- see header.)
    mean = jnp.sum(xb.astype(jnp.float32), axis=-1) * (1.0 / hw)      # (NB, C)

    # --- 1x1 conv #1 + PReLU (single shared slope, read from SMEM) -----------
    s = jnp.dot(mean, w1t_ref[...], preferred_element_type=jnp.float32)
    s = s + b1_ref[...]                                               # (NB, Cs)
    a = a_ref[0]
    s = jnp.where(s >= 0.0, s, a * s)

    # --- 1x1 conv #2 + sigmoid (numerically robust branch form) --------------
    e = jnp.dot(s, w2t_ref[...], preferred_element_type=jnp.float32)
    e = e + b2_ref[...]                                               # (NB, C)
    pos = e >= 0.0
    z = jnp.exp(jnp.where(pos, -e, e))
    gate = jnp.where(pos, 1.0, z) / (1.0 + z)                         # (NB, C) f32

    # --- excite: per-channel scale of the streamed block ---------------------
    if excite_in_act_dtype:
        # v6e/v7x (and any f32 input): multiply in the activation dtype --
        # halves vreg bytes and drops two casts per element on the hot path.
        o_ref[...] = xb * gate.astype(xb.dtype)[:, :, None]
    else:
        # bf16 on v5e (no bf16 VALU): keep the scale in f32, downcast once.
        o_ref[...] = (xb.astype(jnp.float32) * gate[:, :, None]).astype(o_ref.dtype)


def se_layer(x_nchw, w1, b1, prelu_a, w2, b2, *, vmem_block_budget_bytes=None):
    """SE forward: x * sigmoid(conv2(prelu(conv1(global_avg_pool(x)))))."""
    N, C, H, W = x_nchw.shape
    Cs = int(w1.shape[0])
    HW = H * W
    dtype = x_nchw.dtype
    itemsize = jnp.dtype(dtype).itemsize

    # ---- hardware-generation awareness --------------------------------------
    kind = ""
    try:
        kind = jax.devices()[0].device_kind.lower()
    except Exception:
        pass
    two_cores = "v7" in kind                    # v7x: 2 TensorCores / chip
    is_v5 = "v5" in kind
    try:
        vmem_cap = int(pltpu.get_tpu_info().vmem_capacity_bytes)
    except Exception:
        vmem_cap = (64 << 20) if two_cores else (128 << 20)

    # excite multiply in the activation dtype, except bf16 on v5e (no bf16 VALU)
    excite_in_act_dtype = (itemsize >= 4) or (not is_v5)

    # ---- physical (lane/sublane padded) VMEM footprint -----------------------
    sublane = max(8, 32 // itemsize)            # 8 f32 / 16 bf16 / 32 int8
    bpi = _round_up(C, sublane) * _round_up(HW, 128) * itemsize   # bytes / image

    # resident weights & biases (f32, assume double-buffered) -- small but counted
    w_bytes = 2 * 4 * (
        _round_up(C, 8) * _round_up(Cs, 128) +
        _round_up(Cs, 8) * _round_up(C, 128) +
        8 * _round_up(Cs, 128) + 8 * _round_up(C, 128))

    # ---- images per step (NB): a divisor of N -> no pad / no output slice ---
    if vmem_block_budget_bytes is None:
        vmem_block_budget_bytes = (6 << 20) if two_cores else (8 << 20)
    budget = min(vmem_block_budget_bytes, vmem_cap // 4)
    usable = max(4 * bpi, budget - w_bytes - (1 << 20))
    nb_budget = max(1, usable // (4 * bpi))     # in + out, each double-buffered
    nb_block = max(1, (2 << 20) // bpi)         # ~2 MiB x-block ceiling
    nb_floor = max(1, (1 << 20) // bpi)         # ~1 MiB x-block soft floor
    target_steps = 6 if two_cores else 3        # >=3 pipelined steps per core
    nb_steps = max(1, N // target_steps)

    nb_cap = min(N, nb_budget, nb_block)
    # shrink for pipeline depth, but do not drop below ~1 MiB blocks
    nb_cap = min(nb_cap, max(nb_steps, min(nb_floor, nb_cap)))
    NB = _largest_divisor_leq(N, nb_cap)
    n_steps = N // NB

    x_flat = x_nchw.reshape(N, C, HW)

    # 1x1-conv weights pre-transposed (no in-kernel transpose); f32 params
    w1t = jnp.asarray(w1, jnp.float32).reshape(Cs, C).T        # (C, Cs)
    w2t = jnp.asarray(w2, jnp.float32).reshape(C, Cs).T        # (Cs, C)
    b1r = jnp.asarray(b1, jnp.float32).reshape(1, Cs)
    b2r = jnp.asarray(b2, jnp.float32).reshape(1, C)
    a_s = jnp.asarray(prelu_a, jnp.float32).reshape(1)         # SMEM scalar

    # tight, generation-aware VMEM request (no unconditional 32 MiB floor)
    # TODO(synk): if a single image (4*bpi) ever exceeds VMEM, switch to a
    # two-phase version (gate-reduce kernel + HW-tiled scale kernel).
    needed = 4 * NB * bpi + w_bytes + (2 << 20)                # + compiler scratch
    vmem_limit = int(min(max(needed, 4 << 20), int(0.9 * vmem_cap)))

    out = pl.pallas_call(
        functools.partial(se_kernel, excite_in_act_dtype=excite_in_act_dtype),
        out_shape=jax.ShapeDtypeStruct((N, C, HW), dtype),
        grid_spec=pltpu.PrefetchScalarGridSpec(
            num_scalar_prefetch=0,
            grid=(n_steps,),
            in_specs=[
                pl.BlockSpec((NB, C, HW), lambda n: (n, 0, 0)),       # x
                pl.BlockSpec((C, Cs), lambda n: (0, 0)),              # w1.T
                pl.BlockSpec((1, Cs), lambda n: (0, 0)),              # b1
                pl.BlockSpec(memory_space=pltpu.MemorySpace.SMEM),    # PReLU slope
                pl.BlockSpec((Cs, C), lambda n: (0, 0)),              # w2.T
                pl.BlockSpec((1, C), lambda n: (0, 0)),               # b2
            ],
            out_specs=pl.BlockSpec((NB, C, HW), lambda n: (n, 0, 0)),
        ),
        compiler_params=pltpu.CompilerParams(
            dimension_semantics=("parallel",),
            vmem_limit_bytes=vmem_limit,
        ),
    )(x_flat, w1t, b1r, a_s, w2t, b2r)

    return out.reshape(N, C, H, W)


def reference_se(x_nchw, w1, b1, prelu_a, w2, b2):
    # pure-JAX reference for correctness checking (f32 math)
    xf = x_nchw.astype(jnp.float32)
    mean = jnp.mean(xf, axis=(2, 3))                         # (N, C)
    s = mean @ w1.T + b1                                     # (N, Cs)
    s = jnp.where(s >= 0, s, prelu_a * s)
    e = s @ w2.T + b2                                        # (N, C)
    gate = jax.nn.sigmoid(e)
    return xf * gate[:, :, None, None]


if __name__ == "__main__":
    # SELayer(inplanes=16, squeeze_ratio=8) -> hidden channels = 2
    N, C, H, W = 2, 16, 16, 16
    squeeze_ratio = 8
    Cs = C // squeeze_ratio

    key = jax.random.PRNGKey(0)
    kx, kw1, kb1, kw2, kb2 = jax.random.split(key, 5)

    x = jax.random.normal(kx, (N, C, H, W), dtype=jnp.float32)

    # deterministic synthetic parameters (1x1 conv weights squeezed to 2D)
    w1 = 0.1 * jax.random.normal(kw1, (Cs, C), dtype=jnp.float32)
    b1 = 0.1 * jax.random.normal(kb1, (Cs,), dtype=jnp.float32)
    w2 = 0.1 * jax.random.normal(kw2, (C, Cs), dtype=jnp.float32)
    b2 = 0.1 * jax.random.normal(kb2, (C,), dtype=jnp.float32)
    prelu_a = jnp.float32(0.25)  # nn.PReLU() default: one shared parameter

    # f32 activation path
    out = se_layer(x, w1, b1, prelu_a, w2, b2)
    jax.block_until_ready(out)
    ref = reference_se(x, w1, b1, prelu_a, w2, b2)
    assert out.shape == x.shape
    assert jnp.allclose(out, ref, atol=1e-5, rtol=1e-5), "f32 mismatch vs reference"

    # bf16 activation path (halves HBM traffic; gate math stays in f32)
    x_bf16 = x.astype(jnp.bfloat16)
    out_bf16 = se_layer(x_bf16, w1, b1, prelu_a, w2, b2)
    jax.block_until_ready(out_bf16)
    ref_bf16 = reference_se(x_bf16, w1, b1, prelu_a, w2, b2)
    assert out_bf16.dtype == jnp.bfloat16
    assert jnp.allclose(out_bf16.astype(jnp.float32), ref_bf16,
                        atol=5e-2, rtol=5e-2), "bf16 mismatch vs reference"

    # odd batch size: NB is a divisor of N, so still no pad / slice copies
    x3 = jax.random.normal(kx, (3, C, 8, 8), dtype=jnp.float32)
    out3 = se_layer(x3, w1, b1, prelu_a, w2, b2)
    jax.block_until_ready(out3)
    ref3 = reference_se(x3, w1, b1, prelu_a, w2, b2)
    assert jnp.allclose(out3, ref3, atol=1e-5, rtol=1e-5), "odd-batch mismatch"

    print("KERNEL_OK")
</pallas_src>

<mosaic_0001>
module attributes {stable_mosaic.version = 11 : i64} {
  func.func @se_kernel(%arg0: i32, %arg1: memref<2x16x256xf32, #tpu.memory_space<vmem>>, %arg2: memref<16x2xf32, #tpu.memory_space<vmem>>, %arg3: memref<1x2xf32, #tpu.memory_space<vmem>>, %arg4: memref<1xf32, #tpu.memory_space<smem>>, %arg5: memref<2x16xf32, #tpu.memory_space<vmem>>, %arg6: memref<1x16xf32, #tpu.memory_space<vmem>>, %arg7: memref<2x16x256xf32, #tpu.memory_space<vmem>>) attributes {dimension_semantics = [#tpu.dimension_semantics<parallel>], iteration_bounds = array<i64: 1>, scalar_prefetch = 0 : i64, scratch_operands = 0 : i64, tpu.core_type = #tpu.core_type<tc>, window_params = [{transform_indices = @transform_0, window_bounds = array<i64: 2, 16, 256>}, {pipeline_mode = #tpu.pipeline_mode<synchronous>, transform_indices = @transform_1, window_bounds = array<i64: 16, 2>}, {pipeline_mode = #tpu.pipeline_mode<synchronous>, transform_indices = @transform_2, window_bounds = array<i64: 1, 2>}, {transform_indices = @transform_3, window_bounds = array<i64: 1>}, {pipeline_mode = #tpu.pipeline_mode<synchronous>, transform_indices = @transform_4, window_bounds = array<i64: 2, 16>}, {pipeline_mode = #tpu.pipeline_mode<synchronous>, transform_indices = @transform_5, window_bounds = array<i64: 1, 16>}, {transform_indices = @transform_6, window_bounds = array<i64: 2, 16, 256>}]} {
    %c0 = arith.constant 0 : index
    %c0_0 = arith.constant 0 : index
    %c0_1 = arith.constant 0 : index
    %0 = vector.load %arg1[%c0, %c0_0, %c0_1] : memref<2x16x256xf32, #tpu.memory_space<vmem>>, vector<2x16x256xf32>
    %cst = arith.constant dense<0.000000e+00> : vector<2x16xf32>
    %1 = vector.multi_reduction <add>, %0, %cst [2] : vector<2x16x256xf32> to vector<2x16xf32>
    %cst_2 = arith.constant 3.906250e-03 : f32
    %2 = vector.broadcast %cst_2 : f32 to vector<2x16xf32>
    %3 = arith.mulf %1, %2 : vector<2x16xf32>
    %c0_3 = arith.constant 0 : index
    %c0_4 = arith.constant 0 : index
    %4 = vector.load %arg2[%c0_3, %c0_4] : memref<16x2xf32, #tpu.memory_space<vmem>>, vector<16x2xf32>
    %cst_5 = arith.constant dense<0.000000e+00> : vector<2x2xf32>
    %5 = tpu.matmul %3, %4, %cst_5 {dimension_numbers = #tpu.dot_dimension_numbers<[1], [0], [0], [1], [0, 0, 1, 1], [], []>} : vector<2x16xf32>, vector<16x2xf32>, vector<2x2xf32> -> vector<2x2xf32>
    %c0_6 = arith.constant 0 : index
    %c0_7 = arith.constant 0 : index
    %6 = vector.load %arg3[%c0_6, %c0_7] : memref<1x2xf32, #tpu.memory_space<vmem>>, vector<1x2xf32>
    %7 = vector.broadcast %6 : vector<1x2xf32> to vector<2x2xf32>
    %8 = arith.addf %5, %7 : vector<2x2xf32>
    %c0_8 = arith.constant 0 : index
    %9 = memref.load %arg4[%c0_8] : memref<1xf32, #tpu.memory_space<smem>>
    %cst_9 = arith.constant 0.000000e+00 : f32
    %10 = vector.broadcast %cst_9 : f32 to vector<2x2xf32>
    %11 = arith.cmpf oge, %8, %10 : vector<2x2xf32>
    %12 = vector.broadcast %9 : f32 to vector<2x2xf32>
    %13 = arith.mulf %12, %8 : vector<2x2xf32>
    %14 = arith.select %11, %8, %13 : vector<2x2xi1>, vector<2x2xf32>
    %c0_10 = arith.constant 0 : index
    %c0_11 = arith.constant 0 : index
    %15 = vector.load %arg5[%c0_10, %c0_11] : memref<2x16xf32, #tpu.memory_space<vmem>>, vector<2x16xf32>
    %cst_12 = arith.constant dense<0.000000e+00> : vector<2x16xf32>
    %16 = tpu.matmul %14, %15, %cst_12 {dimension_numbers = #tpu.dot_dimension_numbers<[1], [0], [0], [1], [0, 0, 1, 1], [], []>} : vector<2x2xf32>, vector<2x16xf32>, vector<2x16xf32> -> vector<2x16xf32>
    %c0_13 = arith.constant 0 : index
    %c0_14 = arith.constant 0 : index
    %17 = vector.load %arg6[%c0_13, %c0_14] : memref<1x16xf32, #tpu.memory_space<vmem>>, vector<1x16xf32>
    %18 = vector.broadcast %17 : vector<1x16xf32> to vector<2x16xf32>
    %19 = arith.addf %16, %18 : vector<2x16xf32>
    %cst_15 = arith.constant 0.000000e+00 : f32
    %20 = vector.broadcast %cst_15 : f32 to vector<2x16xf32>
    %21 = arith.cmpf oge, %19, %20 : vector<2x16xf32>
    %cst_16 = arith.constant 0.000000e+00 : f32
    %22 = vector.broadcast %cst_16 : f32 to vector<2x16xf32>
    %23 = arith.subf %22, %19 : vector<2x16xf32>
    %24 = arith.select %21, %23, %19 : vector<2x16xi1>, vector<2x16xf32>
    %25 = math.exp %24 : vector<2x16xf32>
    %cst_17 = arith.constant 1.000000e+00 : f32
    %26 = vector.broadcast %cst_17 : f32 to vector<2x16xf32>
    %27 = arith.select %21, %26, %25 : vector<2x16xi1>, vector<2x16xf32>
    %cst_18 = arith.constant 1.000000e+00 : f32
    %28 = vector.broadcast %cst_18 : f32 to vector<2x16xf32>
    %29 = arith.addf %28, %25 : vector<2x16xf32>
    %30 = arith.divf %27, %29 : vector<2x16xf32>
    %31 = vector.shape_cast %30 : vector<2x16xf32> to vector<2x16x1xf32>
    %32 = vector.broadcast %31 : vector<2x16x1xf32> to vector<2x16x256xf32>
    %33 = arith.mulf %0, %32 : vector<2x16x256xf32>
    %c0_19 = arith.constant 0 : index
    %c0_20 = arith.constant 0 : index
    %c0_21 = arith.constant 0 : index
    %34 = vector.load %arg7[%c0_19, %c0_20, %c0_21] : memref<2x16x256xf32, #tpu.memory_space<vmem>>, vector<2x16x256xf32>
    tpu.vector_store %arg7[%c0_19, %c0_20, %c0_21], %33 {strides = array<i32>} : memref<2x16x256xf32, #tpu.memory_space<vmem>>, vector<2x16x256xf32>,
    return
  }
  func.func @transform_0(%arg0: i32) -> (i32, i32, i32) {
    %c0_i32 = arith.constant 0 : i32
    %c0_i32_0 = arith.constant 0 : i32
    %c0_i32_1 = arith.constant 0 : i32
    return %arg0, %c0_i32, %c0_i32_0 : i32, i32, i32
  }
  func.func @transform_1(%arg0: i32) -> (i32, i32) {
    %c0_i32 = arith.constant 0 : i32
    %c0_i32_0 = arith.constant 0 : i32
    %c0_i32_1 = arith.constant 0 : i32
    return %c0_i32, %c0_i32_0 : i32, i32
  }
  func.func @transform_2(%arg0: i32) -> (i32, i32) {
    %c0_i32 = arith.constant 0 : i32
    %c0_i32_0 = arith.constant 0 : i32
    %c0_i32_1 = arith.constant 0 : i32
    return %c0_i32, %c0_i32_0 : i32, i32
  }
  func.func @transform_3(%arg0: i32) -> i32 {
    %c0_i32 = arith.constant 0 : i32
    %c0_i32_0 = arith.constant 0 : i32
    return %c0_i32 : i32
  }
  func.func @transform_4(%arg0: i32) -> (i32, i32) {
    %c0_i32 = arith.constant 0 : i32
    %c0_i32_0 = arith.constant 0 : i32
    %c0_i32_1 = arith.constant 0 : i32
    return %c0_i32, %c0_i32_0 : i32, i32
  }
  func.func @transform_5(%arg0: i32) -> (i32, i32) {
    %c0_i32 = arith.constant 0 : i32
    %c0_i32_0 = arith.constant 0 : i32
    %c0_i32_1 = arith.constant 0 : i32
    return %c0_i32, %c0_i32_0 : i32, i32
  }
  func.func @transform_6(%arg0: i32) -> (i32, i32, i32) {
    %c0_i32 = arith.constant 0 : i32
    %c0_i32_0 = arith.constant 0 : i32
    %c0_i32_1 = arith.constant 0 : i32
    return %arg0, %c0_i32, %c0_i32_0 : i32, i32, i32
  }
}

</mosaic_0001>

<bundles_post_ra>
// kernel: tpu_custom_call.1
= control target key start
LH: loop header
LB: loop body
LE: loop exit
PB: predicated region body
PF: predicated region fallthrough
CT: control target
= control target key end

     0   :  { %12 = vsyncpa [#allocation4], 0  ;;  %s534_s0 = inlined_call_operand.hbm [shape: f32[2,16,256], index: 0, kind: input, shape index: {}]   ;;  %s535_s1 = inlined_call_operand.vmem [shape: f32[16,2], index: 1, kind: input, shape index: {}]   ;;  %s536_s2 = inlined_call_operand.vmem [shape: f32[1,2], index: 2, kind: input, shape index: {}]   ;;  %s537_s3 = inlined_call_operand.<no memory space> [shape: f32[1], index: 3, kind: input, shape index: {}]   ;;  %s538_s4 = inlined_call_operand.vmem [shape: f32[2,16], index: 4, kind: input, shape index: {}]   ;;  %s539_s5 = inlined_call_operand.vmem [shape: f32[1,16], index: 5, kind: input, shape index: {}]   ;;  %s540_s6 = inlined_call_operand.hbm [shape: f32[2,16,256], index: 6, kind: output, shape index: {}]  }
   0x1   :  { %13 = vsyncpa [#allocation5], 0  ;;  %s412_s21 = smov [#allocation3]   ;;  %s364_s25 = scalar_lea.hbm %s534_s0, 1024 }
   0x2   :  { %s19_s22 = sshll.u32 %s412_s21, 4  ;;  %p365_p0 = scmp.ne.s32.totalorder %s534_s0, %s364_s25  ;;  %s20_s22 = int_to_ptr.vmem [resolvable:$true] %s19_s22 }
   0x3   :  { %p368_p1 = scmp.lt.u32.totalorder %s364_s25, %s534_s0 }
   0x5   :  { %p370_p2 = pnand %p368_p1, %p365_p0 }
   0x7   :  { %373 = shalt.err (!%p370_p2)
}
   0x8   :  { %s374_s30 = scalar_lea.vmem %s20_s22, 1024  ;;  %p379_p4 = scmp.lt.s32.totalorder %s20_s22, %s20_s22 }
   0x9   :  { %p375_p3 = scmp.ne.s32.totalorder %s20_s22, %s374_s30  ;;  %p380_p5 = scmp.lt.s32.totalorder %s374_s30, %s374_s30 }
   0xb   :  { %p381_p6 = por %p380_p5, %p379_p4 }
   0xd   :  { %p382_p7 = pnand %p381_p6, %p375_p3 }
   0xf   :  { %385 = shalt.err (!%p382_p7)
}
  0x10   :  { %s413_s7 = smov 256   ;;  %s414_s8 = smov 16  }
  0x11   :  { %25 = dma.hbm_to_vmem [thread:$0]  %s534_s0, 1024, %s20_s22, [#allocation4], %s413_s7, %s413_s7, %s414_s8  }
  0x12   :  { %408 = dma.done.wait [#allocation4], 1024  }
  0x13   :  { %409 = vsyncadd [#allocation4], 4294966272  ;;  %v469_v0 = vld [vmem:[#allocation3 + $0x20] sm:$0xff]  ;;  %v471_v1 = vld [vmem:[#allocation3 + $0x28] sm:$0xff]  ;;  %v415_v15 = vmov 0.0|0.0   ;;  %vm416_vm0 = vmmov 0   ;;  %v76_v17 = vlaneseq  ;;  %v175_v41 = vstv %s537_s3 }
  0x14   :  { %v473_v2 = vld [vmem:[#allocation3] sm:$0xff]  ;;  %v53_v3 = vadd.f32 %v471_v1, %v469_v0  ;;  %v477_v4 = vld [vmem:[#allocation3 + $0x8] sm:$0xff]  ;;  %v479_v5 = vld [vmem:[#allocation3 + $0x30] sm:$0xff]  ;;  %350 = vmatprep.subr.bf16.mxu0 %v415_v15  ;;  %v417_v16 = vmov 0.0   ;;  %vm87_vm1 = vcmask 130112   ;;  %vm98_vm2 = vcmask 1041409  }
  0x15   :  { %v481_v6 = vld [vmem:[#allocation3 + $0x38] sm:$0xff]  ;;  %v47_v7 = vadd.f32 %v477_v4, %v473_v2  ;;  %v485_v8 = vld [vmem:[#allocation3 + $0x10] sm:$0xff]  ;;  %v63_v12 = vld [vmem:[%s535_s1] sm:$0xff]  ;;  %342 = vmatprep.mubr.msk.f32.mxu0 %vm416_vm0, %v417_v16  ;;  %345 = vmatprep.subr.mxu1 %v417_v16  ;;  %v77_v18 = vand.u32 127, %v76_v17  ;;  %v79_v19 = vshrl.u32 %v76_v17, 7  ;;  %vm100_vm3 = vcmask 130048  }
  0x16   :  { %v487_v9 = vld [vmem:[#allocation3 + $0x18] sm:$0xff]  ;;  %54 = vadd.xlane.f32.xlu1 %v53_v3  ;;  %v56_v10 = vadd.f32 %v481_v6, %v479_v5  ;;  %v64_v13 = vld [vmem:[%s535_s1 + $0x8] sm:$0xff]  ;;  %347 = vmatprep.mubr.msk.f32.mxu1 %vm416_vm0, %v417_v16  ;;  %v178_v38 = vld [vmem:[%s538_s4] sm:$0x3]  ;;  %vm190_vm4 = vcmask 1041408   ;;  %vm186_vm6 = vcmask 15360  }
  0x17   :  { %48 = vadd.xlane.f32.xlu0 %v47_v7  ;;  %v50_v11 = vadd.f32 %v487_v9, %v485_v8  ;;  %v351_v14 = vpack.c.bf16 %v64_v13, %v63_v12  ;;  %v82_v20 = vadd.s32 4294967288, %v77_v18  ;;  %v80_v23 = vsub.s32 %v77_v18, %v79_v19  ;;  %346 = vmatpush3.msk.msra.mxu1 %vm190_vm4, %v178_v38  ;;  %v328_v39 = vld [vmem:[%s536_s2] ss:$0 sm:$0xff]  ;;  %s418_s2 = smov [#allocation6]  }
  0x18   :  { %v330_v46 = vld [vmem:[%s539_s5] ss:$0 sm:$0xff]  ;;  %v275_v55 = vsub.s32 0, %v79_v19  ;;  %v286_v60 = vsub.s32 1, %v79_v19  ;;  %s316_s3 = sshll.u32 %s418_s2, 4  ;;  %s317_s3 = int_to_ptr.vmem [resolvable:$true] %s316_s3 }
  0x19   :  { %352 = vmatpush3.bf16.msra.mxu0 %v351_v14  ;;  %v85_v25 = vsub.s32 %v82_v20, %v79_v19  ;;  %s386_s5 = scalar_lea.vmem %s317_s3, 1024  ;;  %p391_p9 = scmp.lt.s32.totalorder %s317_s3, %s317_s3 }
  0x1a   :  { %57 = vadd.xlane.f32.xlu1 %v56_v10  ;;  %p387_p8 = scmp.ne.s32.totalorder %s317_s3, %s386_s5  ;;  %p392_p10 = scmp.lt.s32.totalorder %s386_s5, %s386_s5 }
  0x1b   :  { %51 = vadd.xlane.f32.xlu0 %v50_v11 }
  0x1c   :  { %p393_p11 = por %p392_p10, %p391_p9 }
  0x1e   :  { %p394_p12 = pnand %p393_p11, %p387_p8 }
  0xa3   :  { %v55_v21 = vpop.xlane.xlu1 %54 }
  0xa4   :  { %v49_v22 = vpop.xlane.xlu0 %48  ;;  %v61_v24 = vmul.f32 0.00390625, %v55_v21 }
  0xa5   :  { %v59_v26 = vmul.f32 0.00390625, %v49_v22 }
  0xa6   :  { %v92_v31 = vrot.slane %v61_v24, %v80_v23 }
  0xa7   :  { %v58_v27 = vpop.xlane.xlu1 %57  ;;  %v81_v33 = vrot.slane %v59_v26, %v80_v23 }
  0xa8   :  { %v62_v28 = vmul.f32 0.00390625, %v58_v27  ;;  %v52_v29 = vpop.xlane.xlu0 %51 }
  0xa9   :  { %v60_v30 = vmul.f32 0.00390625, %v52_v29 }
  0xaa   :  { %v96_v32 = vrot.slane %v62_v28, %v85_v25 }
  0xab   :  { %v86_v34 = vrot.slane %v60_v30, %v85_v25 }
  0xac   :  { %v97_v35 = vsel %vm87_vm1, %v96_v32, %v92_v31 }
  0xad   :  { %v88_v36 = vsel %vm87_vm1, %v86_v34, %v81_v33 }
  0xae   :  { %v99_v37 = vsel %vm98_vm2, %v97_v35, %v88_v36 }
  0xaf   :  { %343 = vmatmul.mubr.msk.f32.vlgmr.msra.gmra.mrb[0].mxu0 %vm100_vm3, %v99_v37 }
 0x182   :  { %v169_v40 = vpop.f32.mrb[0].mxu0 }
 0x183   :  { %v170_v42 = vadd.f32 %v328_v39, %v169_v40  ;;  %v344_v43 = vpop.f32.mrb[1].mxu0 }
 0x185   :  { %vm174_vm5 = vcmp.ge.f32.partialorder %v170_v42, 0.0  ;;  %v176_v44 = vmul.f32 %v175_v41, %v170_v42 }
 0x187   :  { %v177_v45 = vsel %vm174_vm5, %v170_v42, %v176_v44 }
 0x188   :  { %348 = vmatmul.mubr.msk.f32.vlgmr.msra.gmra.mrb[0].mxu1 %vm186_vm6, %v177_v45 }
 0x25b   :  { %v260_v47 = vpop.f32.mrb[0].mxu1 }
 0x25c   :  { %v261_v48 = vadd.f32 %v330_v46, %v260_v47  ;;  %v349_v49 = vpop.f32.mrb[1].mxu1 }
 0x25e   :  { %vm264_vm7 = vcmp.ge.f32.partialorder %v261_v48, 0.0  ;;  %v265_v50 = vsub.f32 0.0, %v261_v48 }
 0x260   :  { %v266_v51 = vsel %vm264_vm7, %v265_v50, %v261_v48 }
 0x261   :  { %v267_v52 = vmul.f32 1.442695, %v266_v51 }
 0x263   :  { %360 = vpow2.f32 %v267_v52 }
 0x26d   :  { %v361_v53 = vpop.eup %360 }
 0x26e   :  { %v270_v54 = vadd.f32 1.0, %v361_v53  ;;  %v269_v57 = vsel %vm264_vm7, 1.0, %v361_v53 }
 0x270   :  { %362 = vrcp.f32 %v270_v54 }
 0x27a   :  { %v363_v56 = vpop.eup %362 }
 0x27b   :  { %v272_v58 = vmul.f32 %v363_v56, %v269_v57 }
 0x27d   :  { %v276_v59 = vrot.slane %v272_v58, %v275_v55  ;;  %v287_v61 = vrot.slane %v272_v58, %v286_v60 }
 0x27f   :  { %282 = vbcast.lane.b32.xlu1 %v276_v59, 264  ;;  %278 = vbcast.lane.b32.xlu0 %v276_v59, 256 }
 0x283   :  { %289 = vbcast.lane.b32.xlu1 %v287_v61, 256 }
 0x287   :  { %293 = vbcast.lane.b32.xlu1 %v287_v61, 264 }
 0x2f1   :  { %v283_v62 = vpop.permute.xlu1 %282  ;;  %v279_v63 = vpop.permute.xlu0 %278 }
 0x2f2   :  { %v297_v3 = vmul.f32 %v283_v62, %v485_v8  ;;  %v298_v7 = vmul.f32 %v283_v62, %v487_v9  ;;  %v295_v10 = vmul.f32 %v279_v63, %v473_v2  ;;  %v296_v11 = vmul.f32 %v279_v63, %v477_v4 }
 0x2f4   :  { %305 = vst [vmem:[#allocation6 + $0x10] sm:$0xff] %v297_v3  ;;  %306 = vst [vmem:[#allocation6 + $0x18] sm:$0xff] %v298_v7 }
 0x2f5   :  { %303 = vst [vmem:[#allocation6] sm:$0xff] %v295_v10  ;;  %304 = vst [vmem:[#allocation6 + $0x8] sm:$0xff] %v296_v11  ;;  %v290_v12 = vpop.permute.xlu1 %289 }
 0x2f6   :  { %v299_v13 = vmul.f32 %v290_v12, %v469_v0  ;;  %v300_v14 = vmul.f32 %v290_v12, %v471_v1 }
 0x2f8   :  { %307 = vst [vmem:[#allocation6 + $0x20] sm:$0xff] %v299_v13  ;;  %308 = vst [vmem:[#allocation6 + $0x28] sm:$0xff] %v300_v14 }
 0x2f9   :  { %v294_v8 = vpop.permute.xlu1 %293 }
 0x2fa   :  { %v301_v9 = vmul.f32 %v294_v8, %v479_v5  ;;  %v302_v2 = vmul.f32 %v294_v8, %v481_v6 }
 0x2fc   :  { %309 = vst [vmem:[#allocation6 + $0x30] sm:$0xff] %v301_v9  ;;  %310 = vst [vmem:[#allocation6 + $0x38] sm:$0xff] %v302_v2 }
 0x2fd   :  { %397 = shalt.err (!%p394_p12)
}
 0x2fe   :  { %s398_s22 = scalar_lea.hbm %s540_s6, 1024 }
 0x2ff   :  { %p399_p13 = scmp.ne.s32.totalorder %s540_s6, %s398_s22  ;;  %p402_p0 = scmp.lt.u32.totalorder %s398_s22, %s540_s6 }
 0x301   :  { %p404_p1 = pnand %p402_p0, %p399_p13 }
 0x303   :  { %407 = shalt.err (!%p404_p1)
}
 0x304   :  { %322 = dma.vmem_to_hbm [thread:$0]  %s317_s3, 1024, %s540_s6, [#allocation5], %s413_s7, %s413_s7, %s414_s8  }
 0x305   :  { %410 = dma.done.wait [#allocation5], 1024  }
 0x306   :  { %411 = vsyncadd [#allocation5], 4294966272 }
 0x307   :  { %326 = vsyncpa [#allocation4], 1 }
 0x308   :  { %327 = vsyncpa [#allocation5], 1 }

</bundles_post_ra>
